<compile_context>
chip_gen: v5e
topology: v5e:2x2
jax: 0.10.0
libtpu: 0.0.40
codegen_flags: <defaults>
</compile_context>

<pallas_src>
import functools
import math

import jax
import jax.numpy as jnp
from jax.experimental import pallas as pl
from jax.experimental.pallas import tpu as pltpu


def _round_up(a, b):
    return ((a + b - 1) // b) * b


def _vmem_capacity_bytes():
    """Generation-aware physical VMEM size; conservative fallback."""
    try:
        return int(pltpu.get_tpu_info().vmem_capacity_bytes)
    except Exception:
        return 64 << 20  # v7x has the smallest per-core VMEM (64 MiB); safe everywhere


def _circ_pad_last_kernel(x_ref, o_ref, *, W, p):
    # x_ref: (..., W)   o_ref: (..., W + 2p)   with p > 0
    x = x_ref[...]
    o_ref[...] = jnp.concatenate([x[..., W - p:], x, x[..., :p]], axis=-1)


def custom_pad2d_transp(x, kern_size):
    """Circular pad of the last dim by p = (kern_size - 1) // 2 on each side.

    Matches CustomPad2dTransp.forward for NCHW input:
        (B, C, H, W) -> (B, C, H, W + 2p)
    (works for any rank >= 2; only the last dim is padded).
    """
    p = (kern_size - 1) // 2          # exact integer semantics
    if p == 0:
        return x                      # identity: skip the kernel entirely

    W = x.shape[-1]
    assert p <= W, "circular padding must not exceed the input width"
    Wp = W + 2 * p

    itemsize = jnp.dtype(x.dtype).itemsize
    sub = max(8, 32 // itemsize)      # packed sublane count: 8 f32, 16 bf16, 32 int8
    lane_w = _round_up(W, 128)        # lane-padded widths (VMEM/HBM tile footprint)
    lane_wp = _round_up(Wp, 128)

    vmem_cap = _vmem_capacity_bytes()
    budget = vmem_cap // 2            # target for the double-buffered in+out tiles

    lead = x.shape[:-1]
    H = x.shape[-2] if x.ndim >= 2 else 1

    # Flattening (B,C,H,W)->(B*C*H, W) is layout-free only when H is a multiple
    # of the packed sublane count; otherwise keep a (BC, H, W) view and tile the
    # merged leading dims (always relayout-free).
    per_slice = _round_up(H, sub) * (lane_w + lane_wp) * itemsize
    use_3d = (x.ndim >= 3) and (H % sub != 0) and (2 * per_slice <= budget)

    kernel = functools.partial(_circ_pad_last_kernel, W=W, p=p)

    if use_3d:
        BC = math.prod(x.shape[:-2])
        x_v = x.reshape(BC, H, W)
        t_cap = max(1, budget // (2 * per_slice))      # fits double-buffered in+out
        t_bc = max(1, min(t_cap, pl.cdiv(BC, 8)))      # aim for >= ~8 grid steps
        if t_bc >= BC:
            t_bc = BC
        grid = (pl.cdiv(BC, t_bc),)
        in_specs = [pl.BlockSpec((t_bc, H, W), lambda i: (i, 0, 0))]
        out_specs = pl.BlockSpec((t_bc, H, Wp), lambda i: (i, 0, 0))
        out_shape = jax.ShapeDtypeStruct((BC, H, Wp), x.dtype)
        per_step = 2 * t_bc * per_slice
    else:
        # (If H % sub != 0 and a single slice would blow the budget we still
        # fall through here: correct, at the cost of a possible XLA relayout.)
        M = math.prod(lead) if lead else 1
        x_v = x.reshape(M, W)
        per_row = (lane_w + lane_wp) * itemsize
        tm_cap = max(sub, (budget // (2 * per_row)) // sub * sub)
        tm_target = _round_up(max(1, pl.cdiv(M, 8)), sub)   # >= ~8 grid steps
        tm = min(tm_cap, tm_target)
        if tm >= M:
            tm = M                     # full-extent block is always legal
        grid = (pl.cdiv(M, tm),)
        in_specs = [pl.BlockSpec((tm, W), lambda i: (i, 0))]
        out_specs = pl.BlockSpec((tm, Wp), lambda i: (i, 0))
        out_shape = jax.ShapeDtypeStruct((M, Wp), x.dtype)
        per_step = 2 * _round_up(tm, sub) * per_row

    # Honest VMEM accounting: double-buffered input + output tiles + headroom,
    # never above physical capacity.
    vmem_limit = int(min(vmem_cap, max(per_step + (4 << 20), 16 << 20)))

    out = pl.pallas_call(
        kernel,
        out_shape=out_shape,
        grid_spec=pltpu.PrefetchScalarGridSpec(
            num_scalar_prefetch=0,
            grid=grid,
            in_specs=in_specs,
            out_specs=out_specs,
        ),
        compiler_params=pltpu.CompilerParams(
            dimension_semantics=("parallel",),
            vmem_limit_bytes=vmem_limit,
        ),
    )(x_v)

    return out.reshape(lead + (Wp,)) if lead else out.reshape((Wp,))


def _reference(x, kern_size):
    """Pure-JAX reference matching torch F.pad(..., (p, p, 0, 0), mode='circular')."""
    p = (kern_size - 1) // 2
    if p == 0:
        return x
    return jnp.concatenate([x[..., -p:], x, x[..., :p]], axis=-1)


if __name__ == "__main__":
    key = jax.random.PRNGKey(0)

    # Primary shape consistent with the module's NCHW conv usage.
    x = jax.random.normal(key, (2, 4, 16, 16), jnp.float32)
    out = custom_pad2d_transp(x, 3)
    jax.block_until_ready(out)
    assert out.shape == (2, 4, 16, 18)
    assert jnp.array_equal(out, _reference(x, 3)), "mismatch (k=3)"

    # Larger kernel size, non-square spatial dims (cdiv row-tiled 2D path).
    x2 = jax.random.normal(jax.random.PRNGKey(1), (3, 8, 32, 48), jnp.float32)
    out2 = custom_pad2d_transp(x2, 5)
    jax.block_until_ready(out2)
    assert jnp.array_equal(out2, _reference(x2, 5)), "mismatch (k=5)"

    # H not a multiple of the sublane count -> (BC, H, W) 3D path (no relayout).
    x3 = jax.random.normal(jax.random.PRNGKey(2), (2, 3, 10, 16), jnp.float32)
    out3 = custom_pad2d_transp(x3, 3)
    jax.block_until_ready(out3)
    assert jnp.array_equal(out3, _reference(x3, 3)), "mismatch (H=10 case)"

    # bf16 exercises the dtype-aware (16-row) sublane multiple.
    x4 = jax.random.normal(jax.random.PRNGKey(3), (2, 4, 16, 16), jnp.bfloat16)
    out4 = custom_pad2d_transp(x4, 3)
    jax.block_until_ready(out4)
    assert jnp.array_equal(out4, _reference(x4, 3)), "mismatch (bf16 case)"

    # p == 0 (kern_size = 1) is an identity and skips the kernel entirely.
    out5 = custom_pad2d_transp(x, 1)
    assert out5.shape == x.shape and jnp.array_equal(out5, x), "mismatch (p=0)"

    print("KERNEL_OK")
</pallas_src>

<mosaic_0001>
module attributes {stable_mosaic.version = 11 : i64} {
  func.func @_circ_pad_last_kernel(%arg0: i32, %arg1: memref<16x16xf32, #tpu.memory_space<vmem>>, %arg2: memref<16x18xf32, #tpu.memory_space<vmem>>) attributes {dimension_semantics = [#tpu.dimension_semantics<parallel>], iteration_bounds = array<i64: 8>, scalar_prefetch = 0 : i64, scratch_operands = 0 : i64, tpu.core_type = #tpu.core_type<tc>, window_params = [{transform_indices = @transform_0, window_bounds = array<i64: 16, 16>}, {transform_indices = @transform_1, window_bounds = array<i64: 16, 18>}]} {
    %c0 = arith.constant 0 : index
    %c0_0 = arith.constant 0 : index
    %0 = vector.load %arg1[%c0, %c0_0] : memref<16x16xf32, #tpu.memory_space<vmem>>, vector<16x16xf32>
    %1 = vector.extract_strided_slice %0 {offsets = [0, 15], sizes = [16, 1], strides = [1, 1]} : vector<16x16xf32> to vector<16x1xf32>
    %2 = vector.extract_strided_slice %0 {offsets = [0, 0], sizes = [16, 1], strides = [1, 1]} : vector<16x16xf32> to vector<16x1xf32>
    %3 = tpu.concatenate %1, %0, %2 in 1 : vector<16x1xf32>, vector<16x16xf32>, vector<16x1xf32> -> vector<16x18xf32>
    %c0_1 = arith.constant 0 : index
    %c0_2 = arith.constant 0 : index
    %4 = vector.load %arg2[%c0_1, %c0_2] : memref<16x18xf32, #tpu.memory_space<vmem>>, vector<16x18xf32>
    tpu.vector_store %arg2[%c0_1, %c0_2], %3 {strides = array<i32>} : memref<16x18xf32, #tpu.memory_space<vmem>>, vector<16x18xf32>,
    return
  }
  func.func @transform_0(%arg0: i32) -> (i32, i32) {
    %c0_i32 = arith.constant 0 : i32
    %c0_i32_0 = arith.constant 0 : i32
    return %arg0, %c0_i32 : i32, i32
  }
  func.func @transform_1(%arg0: i32) -> (i32, i32) {
    %c0_i32 = arith.constant 0 : i32
    %c0_i32_0 = arith.constant 0 : i32
    return %arg0, %c0_i32 : i32, i32
  }
}

</mosaic_0001>

<bundles_post_ra>
// kernel: tpu_custom_call.1
= control target key start
LH: loop header
LB: loop body
LE: loop exit
PB: predicated region body
PF: predicated region fallthrough
CT: control target
= control target key end

     0   :  { %s250_s6 = smov 0   ;;  %s267_s0 = inlined_call_operand.vmem [shape: f32[128,16], index: 0, kind: input, shape index: {}]   ;;  %s268_s1 = inlined_call_operand.vmem [shape: f32[128,18], index: 1, kind: output, shape index: {}]  }
   0x1 LB: > { %s207_s7 = sadd.s32 4294967295, %s235_s6   ;;  %p211_p0 = scmp.ge.s32.totalorder %s235_s6, 1  ;;  %s235_s6 = sphi %s250_s6, %s11_s6  }
   0x2   : > { %p88_p1 = scmp.lt.s32.totalorder %s235_s6, 9 }
   0x4   : > { %p89_p2 = pnand %p211_p0, %p88_p1 }
   0x5   : > { %s212_s8 = sshll.u32 (!%p89_p2), %s207_s7, 1  ;;  %s237_s13 = smov (!%p89_p2), 1  }
   0x6   : > { %92 = sbr.rel (%p89_p2) target bundleno = 141 (0x8d), region = 24  ;;  %p109_p3 = scmp.lt.s32.totalorder (!%p89_p2), %s212_s8, 15 }
   0x7   : > { %s238_s14 = smov (!%p89_p2), 113   ;;  %s239_s15 = smov (!%p89_p2), 17  }
   0xb   : > { %s270_s8 = smov (!%p109_p3, %s212_s8), 15  ;;  %vm142_vm0 = vcmask 7168   ;;  %vm145_vm1 = vcmask 138240   ;;  %vm148_vm2 = vcmask 146432  }
   0xc   : > { %s213_s9 = sshll.u32 %s270_s8, 3 }
   0xd   : > { %s112_s12 = scalar_lea.vmem %s267_s0, %s213_s9  ;;  %s118_s18 = scalar_lea.vmem %s268_s1, %s213_s9 }
   0xe   : > { %v120_v0 = vld [vmem:[%s112_s12] sm:$0xff]  ;;  %v121_v1 = vld [vmem:[%s112_s12 + $0x8] sm:$0xff] }
   0xf   : > { %130 = vrot.lane.b32.xlu1 %v120_v0, %s237_s13  ;;  %124 = vrot.lane.b32.xlu0 %v120_v0, %s238_s14 }
  0x10   : > { %136 = vrot.lane.b32.xlu2 %v120_v0, %s239_s15 }
  0x17   : > { %132 = vrot.lane.b32.xlu1 %v121_v1, %s237_s13  ;;  %126 = vrot.lane.b32.xlu0 %v121_v1, %s238_s14 }
  0x18   : > { %138 = vrot.lane.b32.xlu2 %v121_v1, %s239_s15 }
  0x6a   : > { %v137_v2 = vpop.permute.xlu2 %136 }
  0x72   : > { %v139_v7 = vpop.permute.xlu2 %138 }
  0x81   : > { %v131_v3 = vpop.permute.xlu1 %130  ;;  %v125_v4 = vpop.permute.xlu0 %124 }
  0x82   : > { %v143_v5 = vsel %vm142_vm0, %v125_v4, %v131_v3 }
  0x83   : > { %v146_v6 = vsel %vm145_vm1, %v143_v5, %v137_v2 }
  0x84   : > { %149 = vst.msk [vmem:[%s118_s18] sm:$0xff] %vm148_vm2, %v146_v6 }
  0x89   : > { %v133_v8 = vpop.permute.xlu1 %132  ;;  %v127_v9 = vpop.permute.xlu0 %126 }
  0x8a   : > { %v144_v10 = vsel %vm142_vm0, %v127_v9, %v133_v8 }
  0x8b   : > { %v147_v11 = vsel %vm145_vm1, %v144_v10, %v139_v7 }
  0x8c   : > { %150 = vst.msk [vmem:[%s118_s18 + $0x8] sm:$0xff] %vm148_vm2, %v147_v11 }
  0x8d PF: > { %s11_s6 = sadd.s32 1, %s235_s6  }
  0x8e   : > { %p8_p4 = scmp.ge.s32.totalorder %s11_s6, 10  }
  0x90   :  { %10 = sbr.rel (!%p8_p4) target bundleno = 1 (0x1), region = 54 }

</bundles_post_ra>
